<compile_context>
chip_gen: v5e
topology: v5e:2x2
jax: 0.10.0
libtpu: 0.0.40
codegen_flags: <defaults>
</compile_context>

<pallas_src>
import functools

import jax
import jax.numpy as jnp
from jax.experimental import pallas as pl
from jax.experimental.pallas import tpu as pltpu


def _vmem_capacity_bytes() -> int:
    """Physical VMEM capacity (per TensorCore), with a conservative fallback."""
    try:
        info = pltpu.get_tpu_info()
        for attr in ("vmem_capacity_bytes", "vmem_size_bytes", "vmem_bytes"):
            cap = getattr(info, attr, None)
            if cap:
                return int(cap)
    except Exception:
        pass
    return 64 << 20  # v7x per-TC VMEM -- safe lower bound across generations.


def _pfld_partial_kernel(gt_ref, pred_ref, out_ref, *, total_rows, mask_tail):
    """One tile -> lane-resident partial column sums of squared diffs.

    gt_ref / pred_ref: (tile_rows, lanes)   out_ref: (1, 1, lanes) float32

    Only a sublane reduce per tile; the result stays lane-resident so the
    store is a plain unmasked vector store and no per-step scalar chain
    exists. Tail rows of the last (partial) block are masked to zero.
    """
    diff = gt_ref[...].astype(jnp.float32) - pred_ref[...].astype(jnp.float32)
    if mask_tail:
        tile_rows = gt_ref.shape[0]
        row = jax.lax.broadcasted_iota(jnp.int32, diff.shape, 0)
        valid = (pl.program_id(0) * tile_rows + row) < total_rows
        diff = jnp.where(valid, diff, 0.0)
    out_ref[0] = jnp.sum(diff * diff, axis=0, keepdims=True)


def pfld_loss(landmark_gt: jax.Array, landmarks: jax.Array, *,
              lanes: int = 512, tile_rows_cap: int | None = None):
    """Pallas implementation of PFLDLoss.forward.

    Args:
      landmark_gt: (B, D) ground-truth landmarks (flattened coords).
      landmarks:   (B, D) predicted landmarks. Same shape/dtype as gt.
      lanes:       lane width of the flat slab (multiple of 128).
      tile_rows_cap: optional cap on rows per tile (testing / tuning).

    Returns:
      scalar float32 loss.
    """
    assert landmark_gt.shape == landmarks.shape
    assert landmark_gt.dtype == landmarks.dtype
    assert landmark_gt.ndim == 2
    assert lanes % 128 == 0

    B, D = landmark_gt.shape
    N = B * D
    itemsize = jnp.dtype(landmark_gt.dtype).itemsize
    sublane = {4: 8, 2: 16, 1: 32}.get(itemsize, 8)

    # --- lane-dense slab ------------------------------------------------------
    gt = landmark_gt.reshape(-1)
    pred = landmarks.reshape(-1)
    rows = pl.cdiv(N, lanes)
    n_pad = rows * lanes
    if n_pad != N:
        # Tiny flat tail only (< lanes elements); zeros contribute exactly 0.
        gt = jnp.pad(gt, (0, n_pad - N))
        pred = jnp.pad(pred, (0, n_pad - N))
    gt = gt.reshape(rows, lanes)
    pred = pred.reshape(rows, lanes)

    # --- generation-aware tile sizing -----------------------------------------
    vmem_cap = _vmem_capacity_bytes()
    # Cap scoped budget at ~48 MiB (comfortable double-buffering on v7x's
    # 64 MiB, plenty to amortize step overhead on v6e/v5e's 128 MiB).
    vmem_limit = int(min(48 << 20, (vmem_cap * 3) // 4))
    tiling_budget = vmem_limit - (2 << 20)          # headroom: outputs + scratch
    # 2 inputs x 2 pipeline buffers of (tile_rows, lanes).
    max_tile_rows = tiling_budget // (4 * lanes * itemsize)
    max_tile_rows = max(sublane, (max_tile_rows // sublane) * sublane)
    if tile_rows_cap is not None:
        max_tile_rows = min(max_tile_rows,
                            max(sublane, (tile_rows_cap // sublane) * sublane))

    if rows > sublane:
        # Guarantee >= 2 tiles so the parallel grid axis can use both TCs (v7x).
        half = pl.cdiv(pl.cdiv(rows, 2), sublane) * sublane
        tile_rows = min(max_tile_rows, half)
        num_tiles = pl.cdiv(rows, tile_rows)
    else:
        tile_rows = rows            # single full-extent block: no alignment needed
        num_tiles = 1
    mask_tail = (rows % tile_rows) != 0

    kernel = functools.partial(_pfld_partial_kernel,
                               total_rows=rows, mask_tail=mask_tail)

    partials = pl.pallas_call(
        kernel,
        out_shape=jax.ShapeDtypeStruct((num_tiles, 1, lanes), jnp.float32),
        grid=(num_tiles,),
        in_specs=[
            pl.BlockSpec((tile_rows, lanes), lambda i: (i, 0)),
            pl.BlockSpec((tile_rows, lanes), lambda i: (i, 0)),
        ],
        out_specs=pl.BlockSpec((1, 1, lanes), lambda i: (i, 0, 0)),
        compiler_params=pltpu.CompilerParams(
            # Independent per-tile partials -> shard across TCs on v7x.
            dimension_semantics=("parallel",),
            vmem_limit_bytes=vmem_limit,
        ),
        cost_estimate=pl.CostEstimate(
            flops=3 * N,
            transcendentals=0,
            bytes_accessed=2 * N * itemsize + num_tiles * lanes * 4,
        ),
    )(gt, pred)

    # Tiny final cross-lane reduction + mean over the *original* batch size.
    return jnp.sum(partials) / jnp.float32(B)


def pfld_loss_ref(landmark_gt, landmarks):
    l2_distant = jnp.sum((landmark_gt - landmarks) ** 2, axis=1)
    return jnp.mean(l2_distant)


if __name__ == "__main__":
    key = jax.random.PRNGKey(0)
    k1, k2, k3, k4 = jax.random.split(key, 4)

    # PFLD-style: 98 landmarks * 2 coords = 196 features, batch of 16.
    B, D = 16, 196
    landmark_gt = jax.random.normal(k1, (B, D), dtype=jnp.float32)
    landmarks = jax.random.normal(k2, (B, D), dtype=jnp.float32)

    loss = pfld_loss(landmark_gt, landmarks)
    jax.block_until_ready(loss)
    ref = pfld_loss_ref(landmark_gt, landmarks)
    assert jnp.allclose(loss, ref, rtol=1e-5, atol=1e-5), (loss, ref)

    # Multi-tile + in-kernel tail-masking path (rows not divisible by tile).
    B2 = 20
    gt2 = jax.random.normal(k3, (B2, D), dtype=jnp.float32)
    pr2 = jax.random.normal(k4, (B2, D), dtype=jnp.float32)
    loss2 = pfld_loss(gt2, pr2, lanes=128, tile_rows_cap=16)
    jax.block_until_ready(loss2)
    ref2 = pfld_loss_ref(gt2, pr2)
    assert jnp.allclose(loss2, ref2, rtol=1e-5, atol=1e-5), (loss2, ref2)

    # bf16 inputs (half the HBM traffic); kernel upcasts to f32 before squaring.
    gt3 = gt2.astype(jnp.bfloat16)
    pr3 = pr2.astype(jnp.bfloat16)
    loss3 = pfld_loss(gt3, pr3, lanes=128, tile_rows_cap=16)
    jax.block_until_ready(loss3)
    ref3 = pfld_loss_ref(gt3.astype(jnp.float32), pr3.astype(jnp.float32))
    assert jnp.allclose(loss3, ref3, rtol=1e-4, atol=1e-4), (loss3, ref3)

    print("KERNEL_OK")
</pallas_src>

<mosaic_0001>
module attributes {stable_mosaic.version = 11 : i64} {
  func.func @_pfld_partial_kernel(%arg0: i32, %arg1: memref<7x512xf32, #tpu.memory_space<vmem>>, %arg2: memref<7x512xf32, #tpu.memory_space<vmem>>, %arg3: memref<1x1x512xf32, #tpu.memory_space<vmem>>) attributes {dimension_semantics = [#tpu.dimension_semantics<parallel>], iteration_bounds = array<i64: 1>, scalar_prefetch = 0 : i64, scratch_operands = 0 : i64, tpu.core_type = #tpu.core_type<tc>, window_params = [{transform_indices = @transform_0, window_bounds = array<i64: 7, 512>}, {transform_indices = @transform_1, window_bounds = array<i64: 7, 512>}, {transform_indices = @transform_2, window_bounds = array<i64: 1, 1, 512>}]} {
    %c0 = arith.constant 0 : index
    %c0_0 = arith.constant 0 : index
    %0 = vector.load %arg1[%c0, %c0_0] : memref<7x512xf32, #tpu.memory_space<vmem>>, vector<7x512xf32>
    %c0_1 = arith.constant 0 : index
    %c0_2 = arith.constant 0 : index
    %1 = vector.load %arg2[%c0_1, %c0_2] : memref<7x512xf32, #tpu.memory_space<vmem>>, vector<7x512xf32>
    %2 = arith.subf %0, %1 : vector<7x512xf32>
    %3 = arith.mulf %2, %2 : vector<7x512xf32>
    %cst = arith.constant dense<0.000000e+00> : vector<512xf32>
    %4 = vector.multi_reduction <add>, %3, %cst [0] : vector<7x512xf32> to vector<512xf32>
    %5 = vector.shape_cast %4 : vector<512xf32> to vector<1x512xf32>
    %c0_3 = arith.constant 0 : index
    %c0_4 = arith.constant 0 : index
    %c0_5 = arith.constant 0 : index
    %6 = vector.load %arg3[%c0_3, %c0_4, %c0_5] : memref<1x1x512xf32, #tpu.memory_space<vmem>>, vector<1x1x512xf32>
    %7 = vector.shape_cast %6 : vector<1x1x512xf32> to vector<1x512xf32>
    %8 = vector.shape_cast %5 : vector<1x512xf32> to vector<1x1x512xf32>
    tpu.vector_store %arg3[%c0_3, %c0_4, %c0_5], %8 {strides = array<i32>} : memref<1x1x512xf32, #tpu.memory_space<vmem>>, vector<1x1x512xf32>,
    return
  }
  func.func @transform_0(%arg0: i32) -> (i32, i32) {
    %c0_i32 = arith.constant 0 : i32
    %c0_i32_0 = arith.constant 0 : i32
    return %arg0, %c0_i32 : i32, i32
  }
  func.func @transform_1(%arg0: i32) -> (i32, i32) {
    %c0_i32 = arith.constant 0 : i32
    %c0_i32_0 = arith.constant 0 : i32
    return %arg0, %c0_i32 : i32, i32
  }
  func.func @transform_2(%arg0: i32) -> (i32, i32, i32) {
    %c0_i32 = arith.constant 0 : i32
    %c0_i32_0 = arith.constant 0 : i32
    %c0_i32_1 = arith.constant 0 : i32
    return %arg0, %c0_i32, %c0_i32_0 : i32, i32, i32
  }
}

</mosaic_0001>

<bundles_post_ra>
// kernel: tpu_custom_call.1
= control target key start
LH: loop header
LB: loop body
LE: loop exit
PB: predicated region body
PF: predicated region fallthrough
CT: control target
= control target key end

     0   :  { %7 = vsyncpa [#allocation3], 0  ;;  %s230_s0 = inlined_call_operand.hbm [shape: f32[7,512], index: 0, kind: input, shape index: {}]   ;;  %s231_s1 = inlined_call_operand.hbm [shape: f32[7,512], index: 1, kind: input, shape index: {}]   ;;  %s232_s2 = inlined_call_operand.hbm [shape: f32[1,1,512], index: 2, kind: output, shape index: {}]  }
   0x1   :  { %8 = vsyncpa [#allocation6], 0 }
   0x2   :  { %9 = vsyncpa [#allocation4], 0  ;;  %s15_s11 = sshll.u32 %s230_s0, 4  ;;  %s203_s12 = smov [#allocation2]   ;;  %s16_s11 = int_to_ptr.hbm [resolvable:$true] %s15_s11 }
   0x3   :  { %s17_s13 = sshll.u32 %s203_s12, 4  ;;  %s26_s16 = sshll.u32 %s231_s1, 4  ;;  %s18_s13 = int_to_ptr.vmem [resolvable:$true] %s17_s13  ;;  %s27_s16 = int_to_ptr.hbm [resolvable:$true] %s26_s16 }
   0x4   :  { %20 = dma.hbm_to_vmem [thread:$0]  %s16_s11, 512, %s18_s13, [#allocation3]  }
   0x5   :  { %s204_s17 = smov [#allocation5]  }
   0x6   :  { %s28_s18 = sshll.u32 %s204_s17, 4  ;;  %s29_s18 = int_to_ptr.vmem [resolvable:$true] %s28_s18 }
   0x7   :  { %31 = dma.hbm_to_vmem [thread:$0]  %s27_s16, 512, %s29_s18, [#allocation6]  }
   0x8   :  { %197 = dma.done.wait [#allocation3], 512  }
   0x9   :  { %198 = vsyncadd [#allocation3], 4294966784 }
   0xa   :  { %199 = dma.done.wait [#allocation6], 512  }
   0xb   :  { %200 = vsyncadd [#allocation6], 4294966784  ;;  %v40_v0 = vld [vmem:[#allocation2] sm:$0x7f]  ;;  %v41_v1 = vld [vmem:[#allocation2 + $0x8] sm:$0x7f]  ;;  %v99_v42 = vlaneseq }
   0xc   :  { %v42_v2 = vld [vmem:[#allocation2 + $0x10] sm:$0x7f]  ;;  %v43_v3 = vld [vmem:[#allocation2 + $0x18] sm:$0x7f]  ;;  %v44_v4 = vld [vmem:[#allocation5] sm:$0x7f] }
   0xd   :  { %v45_v5 = vld [vmem:[#allocation5 + $0x8] sm:$0x7f]  ;;  %v46_v6 = vld [vmem:[#allocation5 + $0x10] sm:$0x7f]  ;;  %v47_v7 = vld [vmem:[#allocation5 + $0x18] sm:$0x7f]  ;;  %v48_v8 = vsub.f32 %v40_v0, %v44_v4 }
   0xe   :  { %v49_v9 = vsub.f32 %v41_v1, %v45_v5  ;;  %v50_v10 = vsub.f32 %v42_v2, %v46_v6  ;;  %v51_v11 = vsub.f32 %v43_v3, %v47_v7  ;;  %vm56_vm0 = vcmask 1046528   ;;  %s205_s0 = smov [#allocation7]   ;;  %s111_s21 = sshll.u32 %s232_s2, 4  ;;  %s112_s21 = int_to_ptr.hbm [resolvable:$true] %s111_s21 }
   0xf   :  { %v52_v12 = vmul.f32 %v48_v8, %v48_v8  ;;  %vm92_vm1 = vcmask 1040384   ;;  %vm94_vm2 = vcmask 1042434   ;;  %s109_s1 = sshll.u32 %s205_s0, 4  ;;  %vm96_vm3 = vcmask 1041408   ;;  %s110_s1 = int_to_ptr.vmem [resolvable:$true] %s109_s1 }
  0x10   :  { %v53_v13 = vmul.f32 %v49_v9, %v49_v9  ;;  %v54_v14 = vmul.f32 %v50_v10, %v50_v10  ;;  %v55_v15 = vmul.f32 %v51_v11, %v51_v11  ;;  %vm101_vm4 = vcmp.lt.s32.totalorder %v99_v42, 512 }
  0x11   :  { %v57_v16 = vsel %vm56_vm0, %v52_v12, 0.0 }
  0x12   :  { %v64_v17 = vsel %vm56_vm0, %v53_v13, 0.0  ;;  %v58_v18 = vrot.slane %v57_v16, 4  ;;  %v71_v20 = vsel %vm56_vm0, %v54_v14, 0.0  ;;  %v78_v21 = vsel %vm56_vm0, %v55_v15, 0.0 }
  0x13   :  { %v65_v19 = vrot.slane %v64_v17, 4  ;;  %v72_v22 = vrot.slane %v71_v20, 4  ;;  %v79_v23 = vrot.slane %v78_v21, 4 }
  0x14   :  { %v59_v24 = vadd.f32 %v58_v18, %v57_v16 }
  0x15   :  { %v66_v25 = vadd.f32 %v65_v19, %v64_v17  ;;  %v73_v26 = vadd.f32 %v72_v22, %v71_v20  ;;  %v80_v27 = vadd.f32 %v79_v23, %v78_v21 }
  0x16   :  { %v60_v28 = vrot.slane %v59_v24, 2 }
  0x17   :  { %v67_v29 = vrot.slane %v66_v25, 2  ;;  %v74_v30 = vrot.slane %v73_v26, 2  ;;  %v81_v31 = vrot.slane %v80_v27, 2 }
  0x18   :  { %v61_v32 = vadd.f32 %v60_v28, %v59_v24 }
  0x19   :  { %v68_v33 = vadd.f32 %v67_v29, %v66_v25  ;;  %v75_v34 = vadd.f32 %v74_v30, %v73_v26  ;;  %v82_v35 = vadd.f32 %v81_v31, %v80_v27 }
  0x1a   :  { %v62_v36 = vrot.slane %v61_v32, 1 }
  0x1b   :  { %v69_v37 = vrot.slane %v68_v33, 1  ;;  %v76_v38 = vrot.slane %v75_v34, 1  ;;  %v83_v39 = vrot.slane %v82_v35, 1 }
  0x1c   :  { %v63_v40 = vadd.f32 %v62_v36, %v61_v32 }
  0x1d   :  { %v70_v41 = vadd.f32 %v69_v37, %v68_v33  ;;  %v77_v43 = vadd.f32 %v76_v38, %v75_v34  ;;  %v84_v44 = vadd.f32 %v83_v39, %v82_v35 }
  0x1f   :  { %v89_v45 = vrot.slane %v70_v41, 7  ;;  %v90_v46 = vrot.slane %v77_v43, 6  ;;  %v91_v47 = vrot.slane %v84_v44, 5 }
  0x21   :  { %v93_v48 = vsel %vm92_vm1, %v63_v40, %v89_v45  ;;  %v95_v49 = vsel %vm94_vm2, %v90_v46, %v91_v47 }
  0x22   :  { %v97_v50 = vsel %vm96_vm3, %v93_v48, %v95_v49 }
  0x23   :  { %103 = vst.msk [vmem:[#allocation7] sm:$0xf] %vm101_vm4, %v97_v50 }
  0x24   :  { %114 = dma.vmem_to_hbm [thread:$0]  %s110_s1, 64, %s112_s21, [#allocation4]  }
  0x25   :  { %201 = dma.done.wait [#allocation4], 64  }
  0x26   :  { %202 = vsyncadd [#allocation4], 4294967232 }
  0x27   :  { %119 = vsyncpa [#allocation3], 1 }
  0x28   :  { %120 = vsyncpa [#allocation6], 1 }
  0x29   :  { %121 = vsyncpa [#allocation4], 1 }

</bundles_post_ra>
